<compile_context>
chip_gen: v7x
topology: tpu7x:2x2x1
jax: 0.10.0
libtpu: 0.0.40
codegen_flags: <defaults>
</compile_context>

<pallas_src>
import functools

import jax
import jax.numpy as jnp
from jax.experimental import pallas as pl
from jax.experimental.pallas import tpu as pltpu


def qnetwork_kernel(x_ref, w_ref, b_ref, o_ref):
    # x_ref: (tb, S)  w_ref: (S, A)  b_ref: (1, A)  o_ref: (tb, A)
    # W is pre-transposed in the wrapper -> straight MXU matmul, f32 accumulation,
    # f32 bias add on the VPU, store the narrow (A-wide) output block.
    y = jnp.dot(x_ref[...], w_ref[...], preferred_element_type=jnp.float32)
    o_ref[...] = (y + b_ref[...]).astype(o_ref.dtype)


def prepare_params(weight, bias, *, dtype=jnp.float32):
    """One-time parameter prep (hoist out of the training / acting loop):
    transpose W to [S, A] (so the kernel needs no in-kernel relayout).
    dtype=jnp.bfloat16 enables the half-bandwidth input path on v6e/v7x."""
    w_t = weight.T.astype(dtype)                       # [S, A]
    b2d = bias.astype(jnp.float32).reshape(1, -1)      # [1, A], bias add stays f32
    return w_t, b2d


@functools.partial(jax.jit, static_argnames=("block_b", "min_pallas_batch"))
def qnetwork_forward(x, w_t, b2d, *, block_b=8192, min_pallas_batch=0):
    """x: [B, S], w_t: [S, A] (pre-transposed), b2d: [1, A] f32."""
    B, S = x.shape
    S2, A = w_t.shape
    assert S == S2

    if B < min_pallas_batch:
        # Acting-time batches: launch/DMA-latency bound -> fused XLA dot is at
        # least as fast as the custom call.
        return (x.astype(w_t.dtype) @ w_t).astype(jnp.float32) + b2d

    # Match the kernel's compute dtype.  (For the full bf16 win, store x in bf16
    # upstream, e.g. in the replay buffer, so this cast is a no-op.)
    x_in = x if x.dtype == w_t.dtype else x.astype(w_t.dtype)

    # Batch tile: biggest of (B, block_b).  With the narrow output a
    # double-buffered 8192-row f32 tile is ~1.3 MiB -> fits every generation's
    # scoped-VMEM default (v5e 16 MiB, v6e/v7x 32 MiB, v7x 64 MiB physical).
    tb = min(B, block_b)
    if tb != B:
        tb = max(8, (tb // 8) * 8)      # second-to-last block dim multiple of 8
    grid = (pl.cdiv(B, tb),)            # ragged last block handled by Pallas

    return pl.pallas_call(
        qnetwork_kernel,
        out_shape=jax.ShapeDtypeStruct((B, A), jnp.float32),
        grid=grid,
        in_specs=[
            pl.BlockSpec((tb, S), lambda i: (i, 0)),   # x: batch-tiled
            pl.BlockSpec((S, A), lambda i: (0, 0)),    # W^T: resident across grid
            pl.BlockSpec((1, A), lambda i: (0, 0)),    # bias: resident across grid
        ],
        out_specs=pl.BlockSpec((tb, A), lambda i: (i, 0)),
        compiler_params=pltpu.CompilerParams(
            # Batch tiles are independent -> shard across TensorCores on v7x.
            dimension_semantics=("parallel",),
        ),
    )(x_in, w_t, b2d)


if __name__ == "__main__":
    # FrozenLake-v0: num_states = 16, num_actions = 4
    num_states = 16
    num_actions = 4
    batch = 2

    key = jax.random.PRNGKey(0)
    k_x, k_w, k_b, k_x2 = jax.random.split(key, 4)

    # nn.init.uniform_(self.fc.weight, 0, 0.01)
    weight = jax.random.uniform(
        k_w, (num_actions, num_states), dtype=jnp.float32, minval=0.0, maxval=0.01
    )
    # PyTorch default Linear bias init: U(-1/sqrt(fan_in), 1/sqrt(fan_in))
    bound = 1.0 / jnp.sqrt(jnp.float32(num_states))
    bias = jax.random.uniform(
        k_b, (num_actions,), dtype=jnp.float32, minval=-bound, maxval=bound
    )

    # Typical QNetwork input: state-feature vectors of size num_states.
    x = jax.random.uniform(k_x, (batch, num_states), dtype=jnp.float32)

    # --- f32 path, tiny acting-time batch (forced through the Pallas kernel) ---
    w_t, b2d = prepare_params(weight, bias)
    out = qnetwork_forward(x, w_t, b2d, min_pallas_batch=0)
    out = jax.block_until_ready(out)
    ref = x @ weight.T + bias
    assert out.shape == (batch, num_actions)
    assert jnp.allclose(out, ref, atol=1e-5, rtol=1e-5)

    # --- f32 path, multi-tile grid with a ragged last block (B not a multiple
    #     of the batch tile), exercising the pipelined / masked-write path ------
    big_batch = 1000
    x_big = jax.random.uniform(k_x2, (big_batch, num_states), dtype=jnp.float32)
    out_big = qnetwork_forward(x_big, w_t, b2d, block_b=256)
    out_big = jax.block_until_ready(out_big)
    ref_big = x_big @ weight.T + bias
    assert out_big.shape == (big_batch, num_actions)
    assert jnp.allclose(out_big, ref_big, atol=1e-5, rtol=1e-5)

    # --- bf16 input path (half the dominant x HBM stream; f32 accumulation) ----
    w_t16, b2d16 = prepare_params(weight, bias, dtype=jnp.bfloat16)
    out_bf16 = qnetwork_forward(x_big, w_t16, b2d16, block_b=256)
    out_bf16 = jax.block_until_ready(out_bf16)
    assert out_bf16.shape == (big_batch, num_actions)
    assert jnp.allclose(out_bf16, ref_big, atol=5e-3, rtol=5e-2)

    print("KERNEL_OK")
</pallas_src>

<mosaic_0001>
module attributes {stable_mosaic.version = 11 : i64} {
  func.func @qnetwork_kernel(%arg0: i32, %arg1: memref<2x16xf32, #tpu.memory_space<vmem>>, %arg2: memref<16x4xf32, #tpu.memory_space<vmem>>, %arg3: memref<1x4xf32, #tpu.memory_space<vmem>>, %arg4: memref<2x4xf32, #tpu.memory_space<vmem>>) attributes {dimension_semantics = [#tpu.dimension_semantics<parallel>], iteration_bounds = array<i64: 1>, scalar_prefetch = 0 : i64, scratch_operands = 0 : i64, tpu.core_type = #tpu.core_type<tc>, window_params = [{transform_indices = @transform_0, window_bounds = array<i64: 2, 16>}, {pipeline_mode = #tpu.pipeline_mode<synchronous>, transform_indices = @transform_1, window_bounds = array<i64: 16, 4>}, {pipeline_mode = #tpu.pipeline_mode<synchronous>, transform_indices = @transform_2, window_bounds = array<i64: 1, 4>}, {transform_indices = @transform_3, window_bounds = array<i64: 2, 4>}]} {
    %c0 = arith.constant 0 : index
    %c0_0 = arith.constant 0 : index
    %0 = vector.load %arg1[%c0, %c0_0] : memref<2x16xf32, #tpu.memory_space<vmem>>, vector<2x16xf32>
    %c0_1 = arith.constant 0 : index
    %c0_2 = arith.constant 0 : index
    %1 = vector.load %arg2[%c0_1, %c0_2] : memref<16x4xf32, #tpu.memory_space<vmem>>, vector<16x4xf32>
    %cst = arith.constant dense<0.000000e+00> : vector<2x4xf32>
    %2 = tpu.matmul %0, %1, %cst {dimension_numbers = #tpu.dot_dimension_numbers<[1], [0], [0], [1], [0, 0, 1, 1], [], []>} : vector<2x16xf32>, vector<16x4xf32>, vector<2x4xf32> -> vector<2x4xf32>
    %c0_3 = arith.constant 0 : index
    %c0_4 = arith.constant 0 : index
    %3 = vector.load %arg3[%c0_3, %c0_4] : memref<1x4xf32, #tpu.memory_space<vmem>>, vector<1x4xf32>
    %4 = vector.broadcast %3 : vector<1x4xf32> to vector<2x4xf32>
    %5 = arith.addf %2, %4 : vector<2x4xf32>
    %c0_5 = arith.constant 0 : index
    %c0_6 = arith.constant 0 : index
    %6 = vector.load %arg4[%c0_5, %c0_6] : memref<2x4xf32, #tpu.memory_space<vmem>>, vector<2x4xf32>
    tpu.vector_store %arg4[%c0_5, %c0_6], %5 {strides = array<i32>} : memref<2x4xf32, #tpu.memory_space<vmem>>, vector<2x4xf32>,
    return
  }
  func.func @transform_0(%arg0: i32) -> (i32, i32) {
    %c0_i32 = arith.constant 0 : i32
    %c0_i32_0 = arith.constant 0 : i32
    return %arg0, %c0_i32 : i32, i32
  }
  func.func @transform_1(%arg0: i32) -> (i32, i32) {
    %c0_i32 = arith.constant 0 : i32
    %c0_i32_0 = arith.constant 0 : i32
    %c0_i32_1 = arith.constant 0 : i32
    return %c0_i32, %c0_i32_0 : i32, i32
  }
  func.func @transform_2(%arg0: i32) -> (i32, i32) {
    %c0_i32 = arith.constant 0 : i32
    %c0_i32_0 = arith.constant 0 : i32
    %c0_i32_1 = arith.constant 0 : i32
    return %c0_i32, %c0_i32_0 : i32, i32
  }
  func.func @transform_3(%arg0: i32) -> (i32, i32) {
    %c0_i32 = arith.constant 0 : i32
    %c0_i32_0 = arith.constant 0 : i32
    return %arg0, %c0_i32 : i32, i32
  }
}

</mosaic_0001>

<bundles_post_ra>
// kernel: qnetwork_forward.1
= control target key start
LH: loop header
LB: loop body
LE: loop exit
PB: predicated region body
PF: predicated region fallthrough
CT: control target
= control target key end

     0   :  { %v158_v2 = vmov 0.0|0.0   ;;  %vm159_vm0 = vmmov 0   ;;  %v160_v4 = vmov 0.0   ;;  %s206_s0 = inlined_call_operand.vmem [shape: f32[2,16], index: 0, kind: input, shape index: {}]   ;;  %s207_s1 = inlined_call_operand.vmem [shape: f32[16,4], index: 1, kind: input, shape index: {}]   ;;  %s208_s2 = inlined_call_operand.vmem [shape: f32[1,4], index: 2, kind: input, shape index: {}]   ;;  %s209_s3 = inlined_call_operand.hbm [shape: f32[2,4], index: 3, kind: output, shape index: {}]  }
   0x1   :  { %v16_v0 = vld [vmem:[%s207_s1] sm:$0xff]  ;;  %v17_v1 = vld [vmem:[%s207_s1 + $0x8] sm:$0xff]  ;;  %127 = vmatprep.subr.bf16.mxu0 %v158_v2  ;;  %124 = vmatprep.mubr.msk.f32.mxu0 %vm159_vm0, %v160_v4 }
   0x2   :  { %v128_v3 = vpack.c.bf16 %v17_v1, %v16_v0 }
   0x3   :  { %8 = vsyncpa [#allocation3], 0  ;;  %v15_v5 = vld [vmem:[%s206_s0] sm:$0x3]  ;;  %vm25_vm1 = vcmask 130048   ;;  %s161_s20 = smov [#allocation2]  }
   0x4   :  { %129 = vmatpush3.bf16.msra.mxu0 %v128_v3  ;;  %v115_v6 = vld [vmem:[%s208_s2] ss:$0 sm:$0xff]  ;;  %s107_s1 = sshll.u32 %s161_s20, 4  ;;  %vm99_vm2 = vcmask 25600   ;;  %s108_s1 = int_to_ptr.vmem [resolvable:$true] %s107_s1 }
   0x5   :  { %s134_s21 = scalar_lea.vmem %s108_s1, 32  ;;  %p139_p1 = scmp.lt.s32.totalorder %s108_s1, %s108_s1 }
   0x6   :  { %p135_p0 = scmp.ne.s32.totalorder %s108_s1, %s134_s21  ;;  %p140_p2 = scmp.lt.s32.totalorder %s134_s21, %s134_s21 }
   0x7   :  { %125 = vmatmul.mubr.msk.f32.vlgmr.msra.gmra.mrb[0].mxu0 %vm25_vm1, %v15_v5 }
   0x8   :  { %p141_p3 = por %p140_p2, %p139_p1 }
   0xa   :  { %p142_p4 = pnand %p141_p3, %p135_p0 }
  0xda   :  { %v95_v7 = vpop.f32.mrb[0].mxu0 }
  0xdb   :  { %v96_v8 = vadd.f32 %v115_v6, %v95_v7  ;;  %v126_v9 = vpop.f32.mrb[1].mxu0 }
  0xdd   :  { %100 = vst.msk [vmem:[#allocation2] sm:$0x3] %vm99_vm2, %v96_v8 }
  0xde   :  { %145 = shalt.err (!%p142_p4)
}
  0xdf   :  { %s146_s23 = scalar_lea.hbm %s209_s3, 32 }
  0xe0   :  { %p147_p5 = scmp.ne.s32.totalorder %s209_s3, %s146_s23  ;;  %p150_p6 = scmp.lt.u32.totalorder %s146_s23, %s209_s3 }
  0xe2   :  { %p152_p7 = pnand %p150_p6, %p147_p5 }
  0xe4   :  { %155 = shalt.err (!%p152_p7)
}
  0xe5   :  { %110 = dma.vmem_to_hbm [thread:$0]  %s108_s1, 32, %s209_s3, [#allocation3]  }
  0xe6   :  { %156 = dma.done.wait [#allocation3], 32  }
  0xe7   :  { %157 = vsyncadd [#allocation3], 4294967264 }
  0xe8   :  { %114 = vsyncpa [#allocation3], 1 }

</bundles_post_ra>
